<compile_context>
chip_gen: v7x
topology: tpu7x:2x2x1
jax: 0.10.0
libtpu: 0.0.40
codegen_flags: <defaults>
</compile_context>

<pallas_src>
import functools

import jax
import jax.numpy as jnp
from jax.experimental import pallas as pl
from jax.experimental.pallas import tpu as pltpu


def _mha_kernel(*refs, scale, depth, heads_per_group, has_aw, has_acc, approx_recip):
    """One grid step = (one batch tile, one GROUP of `heads_per_group` heads).

    Ref block shapes:
      q_ref/k_ref/v_ref : (Bt, S, D)            compute dtype (bf16 by default)
      wq_ref            : (1, D, Gd)            w_qs^T columns for this head group
      bq_ref            : (1, 1, Gd)            f32
      wfc_ref           : (1, Gd, D)            fc^T rows for this head group
      bfc_ref           : (1, D)                f32
      out_ref           : (Bt, Sq, D)           revisited across the group axis
      aw_ref (optional) : (Bt, G, Sq, Sk)
      acc_ref (optional): (Bt*Sq, D) f32        only present when n_groups > 1
    """
    q_ref, k_ref, v_ref, wq_ref, bq_ref, wfc_ref, bfc_ref = refs[:7]
    rest = list(refs[7:])
    out_ref = rest.pop(0)
    aw_ref = rest.pop(0) if has_aw else None
    acc_ref = rest.pop(0) if has_acc else None

    g = pl.program_id(1)
    n_groups = pl.num_programs(1)

    bt, sq, d_model = q_ref.shape
    _, sk, _ = k_ref.shape
    cdt = q_ref.dtype                    # MXU operand dtype (bf16 default, f32 for the test)

    wq_g = wq_ref[0]                     # (D, Gd)
    bq_g = bq_ref[0]                     # (1, Gd)  f32
    wfc_g = wfc_ref[0]                   # (Gd, D)

    # Fold batch into the matmul M dimension (pure relabel when S is a multiple of 8/16).
    q2 = q_ref[...].reshape(bt * sq, d_model)
    k2 = k_ref[...].reshape(bt * sk, d_model)
    v2 = v_ref[...].reshape(bt * sk, d_model)

    # Group-wide projections: N = Gd keeps the MXU columns busy (q, k AND v use w_qs,
    # matching the reference).  1/sqrt(depth) is folded into the q path.
    q_p = (jnp.dot(q2, wq_g, preferred_element_type=jnp.float32) + bq_g) * scale
    k_p = jnp.dot(k2, wq_g, preferred_element_type=jnp.float32) + bq_g
    v_p = jnp.dot(v2, wq_g, preferred_element_type=jnp.float32) + bq_g

    ctx_cols = []
    aw_heads = []
    for hi in range(heads_per_group):    # static unroll; static lane slices only
        lo = hi * depth
        qh = q_p[:, lo:lo + depth].reshape(bt, sq, depth).astype(cdt)
        kh = k_p[:, lo:lo + depth].reshape(bt, sk, depth).astype(cdt)
        vh = v_p[:, lo:lo + depth].reshape(bt, sk, depth).astype(cdt)

        s = jnp.einsum("bqd,bkd->bqk", qh, kh, preferred_element_type=jnp.float32)
        m = jnp.max(s, axis=-1, keepdims=True)
        e = jnp.exp(s - m)
        # approx=True routes the reciprocal onto the otherwise-idle EUP slot.
        p = e * pl.reciprocal(jnp.sum(e, axis=-1, keepdims=True), approx=approx_recip)
        if has_aw:
            aw_heads.append(p)

        ctx = jnp.einsum("bqk,bkd->bqd", p.astype(cdt), vh,
                         preferred_element_type=jnp.float32)     # (Bt, Sq, depth)
        ctx_cols.append(ctx.reshape(bt * sq, depth))

    if has_aw:
        aw_ref[...] = jnp.stack(aw_heads, axis=1).astype(aw_ref.dtype)   # one block store

    # ONE full-K output-projection matmul per group (K = Gd), replacing H K=depth matmuls.
    ctx_grp = ctx_cols[0] if heads_per_group == 1 else jnp.concatenate(ctx_cols, axis=-1)
    contrib = jnp.dot(ctx_grp.astype(cdt), wfc_g, preferred_element_type=jnp.float32)

    if has_acc:
        @pl.when(g == 0)
        def _init():
            acc_ref[...] = contrib

        @pl.when(g > 0)
        def _accum():
            acc_ref[...] += contrib

        @pl.when(g == n_groups - 1)
        def _finalize():
            out_ref[...] = (acc_ref[...] + bfc_ref[...]).reshape(
                bt, sq, d_model).astype(out_ref.dtype)
    else:
        # Single head group: no accumulator scratch needed (saves VMEM + one copy pass).
        out_ref[...] = (contrib + bfc_ref[...]).reshape(bt, sq, d_model).astype(out_ref.dtype)


def _vmem_capacity_bytes():
    """Physical VMEM per core; conservative 64 MiB (v7x) fallback if the query fails."""
    try:
        cap = int(pltpu.get_tpu_info().vmem_capacity_bytes)
        if cap > 0:
            return cap
    except Exception:
        pass
    return 64 * 1024 * 1024


def _vmem_step_bytes(*, bt, sq, sk, d_model, gd, g, n_groups, cdt_size, out_size,
                     aw_size, with_aw, qkv_buffers):
    """Rough per-grid-step VMEM budget: pipeline buffers + scratch + live f32 intermediates."""
    qkv = qkv_buffers * (bt * sq + 2 * bt * sk) * d_model * cdt_size
    weights = 2 * (2 * d_model * gd * cdt_size + (gd + d_model) * 4)
    out = 2 * bt * sq * d_model * out_size
    aw = 2 * bt * g * sq * sk * aw_size if with_aw else 0
    acc = bt * sq * d_model * 4 if n_groups > 1 else 0
    interm = 4 * (3 * bt * (sq + 2 * sk) * gd      # f32 q/k/v projections
                  + 3 * bt * sq * sk               # scores / exp / probs (one head live)
                  + 2 * bt * sq * gd               # per-head ctx + group concat
                  + bt * sq * d_model)             # fc contribution
    return qkv + weights + out + aw + acc + interm


def _maybe_buffered_spec(block_shape, index_map, buffers):
    """q/k/v blocks only change on the outer batch axis; 3-deep buffering hides their
    HBM->VMEM copies behind more than one head-group step (guarded fallback)."""
    if buffers > 2 and hasattr(pl, "Buffered"):
        try:
            return pl.BlockSpec(block_shape, index_map, pipeline_mode=pl.Buffered(buffers))
        except TypeError:        # pipeline_mode kwarg not available in this Pallas version
            pass
    return pl.BlockSpec(block_shape, index_map)


def multi_head_attention(q, k, v, params, *, num_heads, block_batch=None,
                         heads_per_group=None, return_attention_weights=True,
                         compute_dtype=jnp.bfloat16, aw_dtype=None,
                         approx_reciprocal=None, vmem_limit_bytes=None):
    """q/k/v: (B, S, D) -> (linear_output (B, Sq, D), attention_weights (B, H, Sq, Sk)).

    Production callers should pass return_attention_weights=False (or aw_dtype=bf16) to
    drop / halve the (B,H,Sq,Sk) HBM writeback; it is on by default only for module fidelity.
    """
    B, Sq, D = q.shape
    _, Sk, _ = k.shape
    assert D % num_heads == 0, "d_model must be divisible by num_heads"
    depth = D // num_heads
    out_dtype = q.dtype
    scale = 1.0 / (float(depth) ** 0.5)

    cdt = jnp.dtype(compute_dtype) if compute_dtype is not None else jnp.dtype(q.dtype)
    aw_dt = jnp.dtype(aw_dtype) if aw_dtype is not None else jnp.dtype(out_dtype)
    if approx_reciprocal is None:
        # Exact reciprocal only matters for tight f32 tolerances; bf16 noise dominates otherwise.
        approx_reciprocal = (cdt == jnp.bfloat16)

    # ---- head grouping: projection / fc width Gd = G*depth reaches a full MXU tile ----
    if heads_per_group is None:
        target_n = min(D, 256)   # 256 lanes for v6e/v7x MXU (>=128 also covers v5e)
        heads_per_group = next(gsz for gsz in range(1, num_heads + 1)
                               if num_heads % gsz == 0 and gsz * depth >= target_n)
    assert num_heads % heads_per_group == 0
    G = heads_per_group
    Gd = G * depth
    n_groups = num_heads // G

    # ---- VMEM-aware batch tiling + explicit vmem limit ----
    vmem_cap = _vmem_capacity_bytes()
    vmem_target = int(0.45 * vmem_cap)        # leave headroom for compiler scratch / spills

    def est(bt, bufs):
        return _vmem_step_bytes(bt=bt, sq=Sq, sk=Sk, d_model=D, gd=Gd, g=G,
                                n_groups=n_groups, cdt_size=cdt.itemsize,
                                out_size=jnp.dtype(out_dtype).itemsize,
                                aw_size=aw_dt.itemsize,
                                with_aw=return_attention_weights, qkv_buffers=bufs)

    if block_batch is None:
        divisors = [bt for bt in range(B, 0, -1) if B % bt == 0]
        block_batch = 1
        for min_outer in (4, 2, 1):           # prefer >=4 outer steps for v7x 2-TC balance
            fits = [bt for bt in divisors if B // bt >= min_outer and est(bt, 2) <= vmem_target]
            if fits:
                block_batch = fits[0]
                break
    assert B % block_batch == 0
    Bt = block_batch

    qkv_buffers = 3 if (n_groups >= 2 and est(Bt, 3) <= vmem_target) else 2

    if vmem_limit_bytes is None:
        vmem_limit_bytes = int(min(0.75 * vmem_cap,
                                   max(32 * 1024 * 1024, 2 * est(Bt, qkv_buffers))))

    # ---- glue: torch Linear is y = x @ W^T + b with W:(out,in).  Pre-transpose and
    # pre-split per head GROUP in the wrapper so the kernel never slices the lane axis
    # dynamically.  Head h occupies columns [h*depth, (h+1)*depth) of w_qs^T, matching
    # the reference's view(B, S, H, depth) split. ----
    wq_t = params["w_qs_w"].T.astype(cdt)                                  # (D, D)
    wq_groups = wq_t.reshape(D, n_groups, Gd).transpose(1, 0, 2)           # (nG, D, Gd)
    bq_groups = params["w_qs_b"].astype(jnp.float32).reshape(n_groups, 1, Gd)
    wfc_t = params["fc_w"].T.astype(cdt)                                   # (D, D)
    wfc_groups = wfc_t.reshape(n_groups, Gd, D)                            # (nG, Gd, D)
    bfc = params["fc_b"].astype(jnp.float32).reshape(1, D)

    qc, kc, vc = q.astype(cdt), k.astype(cdt), v.astype(cdt)

    kernel = functools.partial(_mha_kernel, scale=scale, depth=depth,
                               heads_per_group=G, has_aw=return_attention_weights,
                               has_acc=(n_groups > 1), approx_recip=approx_reciprocal)

    in_specs = [
        _maybe_buffered_spec((Bt, Sq, D), lambda b, g: (b, 0, 0), qkv_buffers),  # q
        _maybe_buffered_spec((Bt, Sk, D), lambda b, g: (b, 0, 0), qkv_buffers),  # k
        _maybe_buffered_spec((Bt, Sk, D), lambda b, g: (b, 0, 0), qkv_buffers),  # v
        pl.BlockSpec((1, D, Gd), lambda b, g: (g, 0, 0)),      # w_qs^T group slice
        pl.BlockSpec((1, 1, Gd), lambda b, g: (g, 0, 0)),      # w_qs bias group slice
        pl.BlockSpec((1, Gd, D), lambda b, g: (g, 0, 0)),      # fc^T group slice
        pl.BlockSpec((1, D), lambda b, g: (0, 0)),             # fc bias
    ]
    out_specs = [pl.BlockSpec((Bt, Sq, D), lambda b, g: (b, 0, 0))]
    out_shapes = [jax.ShapeDtypeStruct((B, Sq, D), out_dtype)]
    if return_attention_weights:
        out_specs.append(pl.BlockSpec((Bt, G, Sq, Sk), lambda b, g: (b, g, 0, 0)))
        out_shapes.append(jax.ShapeDtypeStruct((B, num_heads, Sq, Sk), aw_dt))

    scratch_shapes = []
    if n_groups > 1:
        scratch_shapes.append(pltpu.VMEM((Bt * Sq, D), jnp.float32))   # fc accumulator

    grid_spec = pltpu.PrefetchScalarGridSpec(
        num_scalar_prefetch=0,
        grid=(B // Bt, n_groups),
        in_specs=in_specs,
        out_specs=out_specs,
        scratch_shapes=scratch_shapes,
    )

    outs = pl.pallas_call(
        kernel,
        out_shape=tuple(out_shapes),
        grid_spec=grid_spec,
        compiler_params=pltpu.CompilerParams(
            dimension_semantics=("parallel", "arbitrary"),
            vmem_limit_bytes=vmem_limit_bytes),
    )(qc, kc, vc, wq_groups, bq_groups, wfc_groups, bfc)

    if return_attention_weights:
        return outs[0], outs[1]
    return outs[0], None


def _reference(q, k, v, params, *, num_heads):
    """Pure-JAX reference mirroring the PyTorch forward (mask=None, eval mode)."""
    B, Sq, D = q.shape
    depth = D // num_heads
    wq, bq = params["w_qs_w"], params["w_qs_b"]
    wfc, bfc = params["fc_w"], params["fc_b"]

    def proj(x):
        return x @ wq.T + bq

    def split(x):  # (B, S, D) -> (B*H, S, depth)
        Bx, S, _ = x.shape
        return x.reshape(Bx, S, num_heads, depth).transpose(0, 2, 1, 3).reshape(
            Bx * num_heads, S, depth)

    qh, kh, vh = split(proj(q)), split(proj(k)), split(proj(v))
    scores = jnp.einsum("bqd,bkd->bqk", qh, kh) / jnp.sqrt(jnp.float32(depth))
    p = jax.nn.softmax(scores, axis=-1)
    o = jnp.einsum("bqk,bkd->bqd", p, vh)
    o = o.reshape(B, num_heads, Sq, depth).transpose(0, 2, 1, 3).reshape(B, Sq, D)
    out = o @ wfc.T + bfc
    aw = p.reshape(B, num_heads, Sq, -1)
    return out, aw


def init_params(key, d_model):
    """Deterministic params, torch.nn.Linear-style uniform(-1/sqrt(in), 1/sqrt(in))."""
    ks = jax.random.split(key, 4)
    bound = 1.0 / (d_model ** 0.5)
    u = lambda kk, shape: jax.random.uniform(kk, shape, jnp.float32, -bound, bound)
    return {
        "w_qs_w": u(ks[0], (d_model, d_model)),
        "w_qs_b": u(ks[1], (d_model,)),
        "fc_w": u(ks[2], (d_model, d_model)),
        "fc_b": u(ks[3], (d_model,)),
    }


if __name__ == "__main__":
    B, S, D, H = 2, 8, 32, 4   # batch, seq, d_model, heads  (depth = 8)

    key = jax.random.PRNGKey(0)
    kq, kk, kv, kp = jax.random.split(key, 4)
    q = jax.random.normal(kq, (B, S, D), jnp.float32)
    k = jax.random.normal(kk, (B, S, D), jnp.float32)
    v = jax.random.normal(kv, (B, S, D), jnp.float32)
    params = init_params(kp, D)

    ref_out, ref_aw = _reference(q, k, v, params, num_heads=H)

    # Exact-math path (f32 MXU operands, exact reciprocal): tight tolerances.
    out32, aw32 = multi_head_attention(q, k, v, params, num_heads=H,
                                       compute_dtype=jnp.float32)
    out32 = jax.block_until_ready(out32)
    aw32 = jax.block_until_ready(aw32)
    assert out32.shape == (B, S, D) and aw32.shape == (B, H, S, S)
    assert jnp.allclose(out32, ref_out, atol=1e-4, rtol=1e-4)
    assert jnp.allclose(aw32, ref_aw, atol=1e-5, rtol=1e-4)

    # Production default path (bf16 MXU operands, f32 accumulation, EUP reciprocal):
    # tolerances loosened accordingly (review correctness note).
    out_bf, aw_bf = multi_head_attention(q, k, v, params, num_heads=H)
    out_bf = jax.block_until_ready(out_bf)
    aw_bf = jax.block_until_ready(aw_bf)
    assert jnp.allclose(out_bf, ref_out, atol=5e-2, rtol=5e-2)
    assert jnp.allclose(aw_bf, ref_aw, atol=3e-2, rtol=5e-2)

    print("KERNEL_OK")
</pallas_src>

<mosaic_0001>
module attributes {stable_mosaic.version = 11 : i64} {
  func.func @_mha_kernel(%arg0: i32, %arg1: i32, %arg2: memref<1x8x32xf32, #tpu.memory_space<vmem>>, %arg3: memref<1x8x32xf32, #tpu.memory_space<vmem>>, %arg4: memref<1x8x32xf32, #tpu.memory_space<vmem>>, %arg5: memref<1x32x32xf32, #tpu.memory_space<vmem>>, %arg6: memref<1x1x32xf32, #tpu.memory_space<vmem>>, %arg7: memref<1x32x32xf32, #tpu.memory_space<vmem>>, %arg8: memref<1x32xf32, #tpu.memory_space<vmem>>, %arg9: memref<1x8x32xf32, #tpu.memory_space<vmem>>, %arg10: memref<1x4x8x8xf32, #tpu.memory_space<vmem>>) attributes {dimension_semantics = [#tpu.dimension_semantics<parallel>, #tpu.dimension_semantics<arbitrary>], iteration_bounds = array<i64: 2, 1>, scalar_prefetch = 0 : i64, scratch_operands = 0 : i64, tpu.core_type = #tpu.core_type<tc>, window_params = [{transform_indices = @transform_0, window_bounds = array<i64: 1, 8, 32>}, {transform_indices = @transform_1, window_bounds = array<i64: 1, 8, 32>}, {transform_indices = @transform_2, window_bounds = array<i64: 1, 8, 32>}, {transform_indices = @transform_3, window_bounds = array<i64: 1, 32, 32>}, {transform_indices = @transform_4, window_bounds = array<i64: 1, 1, 32>}, {transform_indices = @transform_5, window_bounds = array<i64: 1, 32, 32>}, {pipeline_mode = #tpu.pipeline_mode<synchronous>, transform_indices = @transform_6, window_bounds = array<i64: 1, 32>}, {transform_indices = @transform_7, window_bounds = array<i64: 1, 8, 32>}, {transform_indices = @transform_8, window_bounds = array<i64: 1, 4, 8, 8>}]} {
    %c0 = arith.constant 0 : index
    %c0_0 = arith.constant 0 : index
    %c0_1 = arith.constant 0 : index
    %0 = vector.load %arg5[%c0, %c0_0, %c0_1] : memref<1x32x32xf32, #tpu.memory_space<vmem>>, vector<1x32x32xf32>
    %1 = vector.shape_cast %0 : vector<1x32x32xf32> to vector<32x32xf32>
    %c0_2 = arith.constant 0 : index
    %c0_3 = arith.constant 0 : index
    %c0_4 = arith.constant 0 : index
    %2 = vector.load %arg6[%c0_2, %c0_3, %c0_4] : memref<1x1x32xf32, #tpu.memory_space<vmem>>, vector<1x1x32xf32>
    %3 = vector.shape_cast %2 : vector<1x1x32xf32> to vector<1x32xf32>
    %c0_5 = arith.constant 0 : index
    %c0_6 = arith.constant 0 : index
    %c0_7 = arith.constant 0 : index
    %4 = vector.load %arg7[%c0_5, %c0_6, %c0_7] : memref<1x32x32xf32, #tpu.memory_space<vmem>>, vector<1x32x32xf32>
    %5 = vector.shape_cast %4 : vector<1x32x32xf32> to vector<32x32xf32>
    %c0_8 = arith.constant 0 : index
    %c0_9 = arith.constant 0 : index
    %c0_10 = arith.constant 0 : index
    %6 = vector.load %arg2[%c0_8, %c0_9, %c0_10] : memref<1x8x32xf32, #tpu.memory_space<vmem>>, vector<1x8x32xf32>
    %7 = vector.shape_cast %6 : vector<1x8x32xf32> to vector<8x32xf32>
    %c0_11 = arith.constant 0 : index
    %c0_12 = arith.constant 0 : index
    %c0_13 = arith.constant 0 : index
    %8 = vector.load %arg3[%c0_11, %c0_12, %c0_13] : memref<1x8x32xf32, #tpu.memory_space<vmem>>, vector<1x8x32xf32>
    %9 = vector.shape_cast %8 : vector<1x8x32xf32> to vector<8x32xf32>
    %c0_14 = arith.constant 0 : index
    %c0_15 = arith.constant 0 : index
    %c0_16 = arith.constant 0 : index
    %10 = vector.load %arg4[%c0_14, %c0_15, %c0_16] : memref<1x8x32xf32, #tpu.memory_space<vmem>>, vector<1x8x32xf32>
    %11 = vector.shape_cast %10 : vector<1x8x32xf32> to vector<8x32xf32>
    %cst = arith.constant dense<0.000000e+00> : vector<8x32xf32>
    %12 = tpu.matmul %7, %1, %cst {dimension_numbers = #tpu.dot_dimension_numbers<[1], [0], [0], [1], [0, 0, 1, 1], [], []>} : vector<8x32xf32>, vector<32x32xf32>, vector<8x32xf32> -> vector<8x32xf32>
    %13 = vector.broadcast %3 : vector<1x32xf32> to vector<8x32xf32>
    %14 = arith.addf %12, %13 : vector<8x32xf32>
    %cst_17 = arith.constant 0.353553385 : f32
    %15 = vector.broadcast %cst_17 : f32 to vector<8x32xf32>
    %16 = arith.mulf %14, %15 : vector<8x32xf32>
    %cst_18 = arith.constant dense<0.000000e+00> : vector<8x32xf32>
    %17 = tpu.matmul %9, %1, %cst_18 {dimension_numbers = #tpu.dot_dimension_numbers<[1], [0], [0], [1], [0, 0, 1, 1], [], []>} : vector<8x32xf32>, vector<32x32xf32>, vector<8x32xf32> -> vector<8x32xf32>
    %18 = vector.broadcast %3 : vector<1x32xf32> to vector<8x32xf32>
    %19 = arith.addf %17, %18 : vector<8x32xf32>
    %cst_19 = arith.constant dense<0.000000e+00> : vector<8x32xf32>
    %20 = tpu.matmul %11, %1, %cst_19 {dimension_numbers = #tpu.dot_dimension_numbers<[1], [0], [0], [1], [0, 0, 1, 1], [], []>} : vector<8x32xf32>, vector<32x32xf32>, vector<8x32xf32> -> vector<8x32xf32>
    %21 = vector.broadcast %3 : vector<1x32xf32> to vector<8x32xf32>
    %22 = arith.addf %20, %21 : vector<8x32xf32>
    %23 = vector.extract_strided_slice %16 {offsets = [0, 0], sizes = [8, 8], strides = [1, 1]} : vector<8x32xf32> to vector<8x8xf32>
    %24 = vector.shape_cast %23 : vector<8x8xf32> to vector<1x8x8xf32>
    %25 = vector.extract_strided_slice %19 {offsets = [0, 0], sizes = [8, 8], strides = [1, 1]} : vector<8x32xf32> to vector<8x8xf32>
    %26 = vector.shape_cast %25 : vector<8x8xf32> to vector<1x8x8xf32>
    %27 = vector.extract_strided_slice %22 {offsets = [0, 0], sizes = [8, 8], strides = [1, 1]} : vector<8x32xf32> to vector<8x8xf32>
    %28 = vector.shape_cast %27 : vector<8x8xf32> to vector<1x8x8xf32>
    "tpu.trace_start"() <{level = 10 : i32, message = "bqd,bkd->bqk"}> : () -> ()
    %cst_20 = arith.constant dense<0.000000e+00> : vector<1x8x8xf32>
    %29 = tpu.matmul %24, %26, %cst_20 {dimension_numbers = #tpu.dot_dimension_numbers<[2], [2], [1], [1], [0, 0, 0, 1, 1, 1], [0], [0]>} : vector<1x8x8xf32>, vector<1x8x8xf32>, vector<1x8x8xf32> -> vector<1x8x8xf32>
    "tpu.trace_stop"() : () -> ()
    %cst_21 = arith.constant dense<0xFF800000> : vector<1x8xf32>
    %30 = vector.multi_reduction <maximumf>, %29, %cst_21 [2] : vector<1x8x8xf32> to vector<1x8xf32>
    %31 = vector.shape_cast %30 : vector<1x8xf32> to vector<1x8x1xf32>
    %32 = vector.broadcast %31 : vector<1x8x1xf32> to vector<1x8x8xf32>
    %33 = arith.subf %29, %32 : vector<1x8x8xf32>
    %34 = math.exp %33 : vector<1x8x8xf32>
    %cst_22 = arith.constant dense<0.000000e+00> : vector<1x8xf32>
    %35 = vector.multi_reduction <add>, %34, %cst_22 [2] : vector<1x8x8xf32> to vector<1x8xf32>
    %36 = vector.shape_cast %35 : vector<1x8xf32> to vector<1x8x1xf32>
    %37 = tpu.reciprocal %36 : vector<1x8x1xf32> -> vector<1x8x1xf32>
    %38 = vector.broadcast %37 : vector<1x8x1xf32> to vector<1x8x8xf32>
    %39 = arith.mulf %34, %38 : vector<1x8x8xf32>
    "tpu.trace_start"() <{level = 10 : i32, message = "bqk,bkd->bqd"}> : () -> ()
    %cst_23 = arith.constant dense<0.000000e+00> : vector<1x8x8xf32>
    %40 = tpu.matmul %39, %28, %cst_23 {dimension_numbers = #tpu.dot_dimension_numbers<[2], [1], [1], [2], [0, 0, 0, 1, 1, 2], [0], [0]>} : vector<1x8x8xf32>, vector<1x8x8xf32>, vector<1x8x8xf32> -> vector<1x8x8xf32>
    "tpu.trace_stop"() : () -> ()
    %41 = vector.shape_cast %40 : vector<1x8x8xf32> to vector<8x8xf32>
    %42 = vector.extract_strided_slice %16 {offsets = [0, 8], sizes = [8, 8], strides = [1, 1]} : vector<8x32xf32> to vector<8x8xf32>
    %43 = vector.shape_cast %42 : vector<8x8xf32> to vector<1x8x8xf32>
    %44 = vector.extract_strided_slice %19 {offsets = [0, 8], sizes = [8, 8], strides = [1, 1]} : vector<8x32xf32> to vector<8x8xf32>
    %45 = vector.shape_cast %44 : vector<8x8xf32> to vector<1x8x8xf32>
    %46 = vector.extract_strided_slice %22 {offsets = [0, 8], sizes = [8, 8], strides = [1, 1]} : vector<8x32xf32> to vector<8x8xf32>
    %47 = vector.shape_cast %46 : vector<8x8xf32> to vector<1x8x8xf32>
    "tpu.trace_start"() <{level = 10 : i32, message = "bqd,bkd->bqk"}> : () -> ()
    %cst_24 = arith.constant dense<0.000000e+00> : vector<1x8x8xf32>
    %48 = tpu.matmul %43, %45, %cst_24 {dimension_numbers = #tpu.dot_dimension_numbers<[2], [2], [1], [1], [0, 0, 0, 1, 1, 1], [0], [0]>} : vector<1x8x8xf32>, vector<1x8x8xf32>, vector<1x8x8xf32> -> vector<1x8x8xf32>
    "tpu.trace_stop"() : () -> ()
    %cst_25 = arith.constant dense<0xFF800000> : vector<1x8xf32>
    %49 = vector.multi_reduction <maximumf>, %48, %cst_25 [2] : vector<1x8x8xf32> to vector<1x8xf32>
    %50 = vector.shape_cast %49 : vector<1x8xf32> to vector<1x8x1xf32>
    %51 = vector.broadcast %50 : vector<1x8x1xf32> to vector<1x8x8xf32>
    %52 = arith.subf %48, %51 : vector<1x8x8xf32>
    %53 = math.exp %52 : vector<1x8x8xf32>
    %cst_26 = arith.constant dense<0.000000e+00> : vector<1x8xf32>
    %54 = vector.multi_reduction <add>, %53, %cst_26 [2] : vector<1x8x8xf32> to vector<1x8xf32>
    %55 = vector.shape_cast %54 : vector<1x8xf32> to vector<1x8x1xf32>
    %56 = tpu.reciprocal %55 : vector<1x8x1xf32> -> vector<1x8x1xf32>
    %57 = vector.broadcast %56 : vector<1x8x1xf32> to vector<1x8x8xf32>
    %58 = arith.mulf %53, %57 : vector<1x8x8xf32>
    "tpu.trace_start"() <{level = 10 : i32, message = "bqk,bkd->bqd"}> : () -> ()
    %cst_27 = arith.constant dense<0.000000e+00> : vector<1x8x8xf32>
    %59 = tpu.matmul %58, %47, %cst_27 {dimension_numbers = #tpu.dot_dimension_numbers<[2], [1], [1], [2], [0, 0, 0, 1, 1, 2], [0], [0]>} : vector<1x8x8xf32>, vector<1x8x8xf32>, vector<1x8x8xf32> -> vector<1x8x8xf32>
    "tpu.trace_stop"() : () -> ()
    %60 = vector.shape_cast %59 : vector<1x8x8xf32> to vector<8x8xf32>
    %61 = vector.extract_strided_slice %16 {offsets = [0, 16], sizes = [8, 8], strides = [1, 1]} : vector<8x32xf32> to vector<8x8xf32>
    %62 = vector.shape_cast %61 : vector<8x8xf32> to vector<1x8x8xf32>
    %63 = vector.extract_strided_slice %19 {offsets = [0, 16], sizes = [8, 8], strides = [1, 1]} : vector<8x32xf32> to vector<8x8xf32>
    %64 = vector.shape_cast %63 : vector<8x8xf32> to vector<1x8x8xf32>
    %65 = vector.extract_strided_slice %22 {offsets = [0, 16], sizes = [8, 8], strides = [1, 1]} : vector<8x32xf32> to vector<8x8xf32>
    %66 = vector.shape_cast %65 : vector<8x8xf32> to vector<1x8x8xf32>
    "tpu.trace_start"() <{level = 10 : i32, message = "bqd,bkd->bqk"}> : () -> ()
    %cst_28 = arith.constant dense<0.000000e+00> : vector<1x8x8xf32>
    %67 = tpu.matmul %62, %64, %cst_28 {dimension_numbers = #tpu.dot_dimension_numbers<[2], [2], [1], [1], [0, 0, 0, 1, 1, 1], [0], [0]>} : vector<1x8x8xf32>, vector<1x8x8xf32>, vector<1x8x8xf32> -> vector<1x8x8xf32>
    "tpu.trace_stop"() : () -> ()
    %cst_29 = arith.constant dense<0xFF800000> : vector<1x8xf32>
    %68 = vector.multi_reduction <maximumf>, %67, %cst_29 [2] : vector<1x8x8xf32> to vector<1x8xf32>
    %69 = vector.shape_cast %68 : vector<1x8xf32> to vector<1x8x1xf32>
    %70 = vector.broadcast %69 : vector<1x8x1xf32> to vector<1x8x8xf32>
    %71 = arith.subf %67, %70 : vector<1x8x8xf32>
    %72 = math.exp %71 : vector<1x8x8xf32>
    %cst_30 = arith.constant dense<0.000000e+00> : vector<1x8xf32>
    %73 = vector.multi_reduction <add>, %72, %cst_30 [2] : vector<1x8x8xf32> to vector<1x8xf32>
    %74 = vector.shape_cast %73 : vector<1x8xf32> to vector<1x8x1xf32>
    %75 = tpu.reciprocal %74 : vector<1x8x1xf32> -> vector<1x8x1xf32>
    %76 = vector.broadcast %75 : vector<1x8x1xf32> to vector<1x8x8xf32>
    %77 = arith.mulf %72, %76 : vector<1x8x8xf32>
    "tpu.trace_start"() <{level = 10 : i32, message = "bqk,bkd->bqd"}> : () -> ()
    %cst_31 = arith.constant dense<0.000000e+00> : vector<1x8x8xf32>
    %78 = tpu.matmul %77, %66, %cst_31 {dimension_numbers = #tpu.dot_dimension_numbers<[2], [1], [1], [2], [0, 0, 0, 1, 1, 2], [0], [0]>} : vector<1x8x8xf32>, vector<1x8x8xf32>, vector<1x8x8xf32> -> vector<1x8x8xf32>
    "tpu.trace_stop"() : () -> ()
    %79 = vector.shape_cast %78 : vector<1x8x8xf32> to vector<8x8xf32>
    %80 = vector.extract_strided_slice %16 {offsets = [0, 24], sizes = [8, 8], strides = [1, 1]} : vector<8x32xf32> to vector<8x8xf32>
    %81 = vector.shape_cast %80 : vector<8x8xf32> to vector<1x8x8xf32>
    %82 = vector.extract_strided_slice %19 {offsets = [0, 24], sizes = [8, 8], strides = [1, 1]} : vector<8x32xf32> to vector<8x8xf32>
    %83 = vector.shape_cast %82 : vector<8x8xf32> to vector<1x8x8xf32>
    %84 = vector.extract_strided_slice %22 {offsets = [0, 24], sizes = [8, 8], strides = [1, 1]} : vector<8x32xf32> to vector<8x8xf32>
    %85 = vector.shape_cast %84 : vector<8x8xf32> to vector<1x8x8xf32>
    "tpu.trace_start"() <{level = 10 : i32, message = "bqd,bkd->bqk"}> : () -> ()
    %cst_32 = arith.constant dense<0.000000e+00> : vector<1x8x8xf32>
    %86 = tpu.matmul %81, %83, %cst_32 {dimension_numbers = #tpu.dot_dimension_numbers<[2], [2], [1], [1], [0, 0, 0, 1, 1, 1], [0], [0]>} : vector<1x8x8xf32>, vector<1x8x8xf32>, vector<1x8x8xf32> -> vector<1x8x8xf32>
    "tpu.trace_stop"() : () -> ()
    %cst_33 = arith.constant dense<0xFF800000> : vector<1x8xf32>
    %87 = vector.multi_reduction <maximumf>, %86, %cst_33 [2] : vector<1x8x8xf32> to vector<1x8xf32>
    %88 = vector.shape_cast %87 : vector<1x8xf32> to vector<1x8x1xf32>
    %89 = vector.broadcast %88 : vector<1x8x1xf32> to vector<1x8x8xf32>
    %90 = arith.subf %86, %89 : vector<1x8x8xf32>
    %91 = math.exp %90 : vector<1x8x8xf32>
    %cst_34 = arith.constant dense<0.000000e+00> : vector<1x8xf32>
    %92 = vector.multi_reduction <add>, %91, %cst_34 [2] : vector<1x8x8xf32> to vector<1x8xf32>
    %93 = vector.shape_cast %92 : vector<1x8xf32> to vector<1x8x1xf32>
    %94 = tpu.reciprocal %93 : vector<1x8x1xf32> -> vector<1x8x1xf32>
    %95 = vector.broadcast %94 : vector<1x8x1xf32> to vector<1x8x8xf32>
    %96 = arith.mulf %91, %95 : vector<1x8x8xf32>
    "tpu.trace_start"() <{level = 10 : i32, message = "bqk,bkd->bqd"}> : () -> ()
    %cst_35 = arith.constant dense<0.000000e+00> : vector<1x8x8xf32>
    %97 = tpu.matmul %96, %85, %cst_35 {dimension_numbers = #tpu.dot_dimension_numbers<[2], [1], [1], [2], [0, 0, 0, 1, 1, 2], [0], [0]>} : vector<1x8x8xf32>, vector<1x8x8xf32>, vector<1x8x8xf32> -> vector<1x8x8xf32>
    "tpu.trace_stop"() : () -> ()
    %98 = vector.shape_cast %97 : vector<1x8x8xf32> to vector<8x8xf32>
    %99 = vector.shape_cast %39 : vector<1x8x8xf32> to vector<1x1x8x8xf32>
    %100 = vector.shape_cast %58 : vector<1x8x8xf32> to vector<1x1x8x8xf32>
    %101 = vector.shape_cast %77 : vector<1x8x8xf32> to vector<1x1x8x8xf32>
    %102 = vector.shape_cast %96 : vector<1x8x8xf32> to vector<1x1x8x8xf32>
    %103 = tpu.concatenate %99, %100, %101, %102 in 1 : vector<1x1x8x8xf32>, vector<1x1x8x8xf32>, vector<1x1x8x8xf32>, vector<1x1x8x8xf32> -> vector<1x4x8x8xf32>
    %c0_36 = arith.constant 0 : index
    %c0_37 = arith.constant 0 : index
    %c0_38 = arith.constant 0 : index
    %c0_39 = arith.constant 0 : index
    %104 = vector.load %arg10[%c0_36, %c0_37, %c0_38, %c0_39] : memref<1x4x8x8xf32, #tpu.memory_space<vmem>>, vector<1x4x8x8xf32>
    tpu.vector_store %arg10[%c0_36, %c0_37, %c0_38, %c0_39], %103 {strides = array<i32>} : memref<1x4x8x8xf32, #tpu.memory_space<vmem>>, vector<1x4x8x8xf32>,
    %105 = tpu.concatenate %41, %60, %79, %98 in 1 : vector<8x8xf32>, vector<8x8xf32>, vector<8x8xf32>, vector<8x8xf32> -> vector<8x32xf32>
    %cst_40 = arith.constant dense<0.000000e+00> : vector<8x32xf32>
    %106 = tpu.matmul %105, %5, %cst_40 {dimension_numbers = #tpu.dot_dimension_numbers<[1], [0], [0], [1], [0, 0, 1, 1], [], []>} : vector<8x32xf32>, vector<32x32xf32>, vector<8x32xf32> -> vector<8x32xf32>
    %c0_41 = arith.constant 0 : index
    %c0_42 = arith.constant 0 : index
    %107 = vector.load %arg8[%c0_41, %c0_42] : memref<1x32xf32, #tpu.memory_space<vmem>>, vector<1x32xf32>
    %108 = vector.broadcast %107 : vector<1x32xf32> to vector<8x32xf32>
    %109 = arith.addf %106, %108 : vector<8x32xf32>
    %110 = vector.shape_cast %109 : vector<8x32xf32> to vector<1x8x32xf32>
    %c0_43 = arith.constant 0 : index
    %c0_44 = arith.constant 0 : index
    %c0_45 = arith.constant 0 : index
    %111 = vector.load %arg9[%c0_43, %c0_44, %c0_45] : memref<1x8x32xf32, #tpu.memory_space<vmem>>, vector<1x8x32xf32>
    tpu.vector_store %arg9[%c0_43, %c0_44, %c0_45], %110 {strides = array<i32>} : memref<1x8x32xf32, #tpu.memory_space<vmem>>, vector<1x8x32xf32>,
    return
  }
  func.func @transform_0(%arg0: i32, %arg1: i32) -> (i32, i32, i32) {
    %c0_i32 = arith.constant 0 : i32
    %c0_i32_0 = arith.constant 0 : i32
    %c0_i32_1 = arith.constant 0 : i32
    return %arg0, %c0_i32, %c0_i32_0 : i32, i32, i32
  }
  func.func @transform_1(%arg0: i32, %arg1: i32) -> (i32, i32, i32) {
    %c0_i32 = arith.constant 0 : i32
    %c0_i32_0 = arith.constant 0 : i32
    %c0_i32_1 = arith.constant 0 : i32
    return %arg0, %c0_i32, %c0_i32_0 : i32, i32, i32
  }
  func.func @transform_2(%arg0: i32, %arg1: i32) -> (i32, i32, i32) {
    %c0_i32 = arith.constant 0 : i32
    %c0_i32_0 = arith.constant 0 : i32
    %c0_i32_1 = arith.constant 0 : i32
    return %arg0, %c0_i32, %c0_i32_0 : i32, i32, i32
  }
  func.func @transform_3(%arg0: i32, %arg1: i32) -> (i32, i32, i32) {
    %c0_i32 = arith.constant 0 : i32
    %c0_i32_0 = arith.constant 0 : i32
    %c0_i32_1 = arith.constant 0 : i32
    return %arg1, %c0_i32, %c0_i32_0 : i32, i32, i32
  }
  func.func @transform_4(%arg0: i32, %arg1: i32) -> (i32, i32, i32) {
    %c0_i32 = arith.constant 0 : i32
    %c0_i32_0 = arith.constant 0 : i32
    %c0_i32_1 = arith.constant 0 : i32
    return %arg1, %c0_i32, %c0_i32_0 : i32, i32, i32
  }
  func.func @transform_5(%arg0: i32, %arg1: i32) -> (i32, i32, i32) {
    %c0_i32 = arith.constant 0 : i32
    %c0_i32_0 = arith.constant 0 : i32
    %c0_i32_1 = arith.constant 0 : i32
    return %arg1, %c0_i32, %c0_i32_0 : i32, i32, i32
  }
  func.func @transform_6(%arg0: i32, %arg1: i32) -> (i32, i32) {
    %c0_i32 = arith.constant 0 : i32
    %c0_i32_0 = arith.constant 0 : i32
    %c0_i32_1 = arith.constant 0 : i32
    return %c0_i32, %c0_i32_0 : i32, i32
  }
  func.func @transform_7(%arg0: i32, %arg1: i32) -> (i32, i32, i32) {
    %c0_i32 = arith.constant 0 : i32
    %c0_i32_0 = arith.constant 0 : i32
    %c0_i32_1 = arith.constant 0 : i32
    return %arg0, %c0_i32, %c0_i32_0 : i32, i32, i32
  }
  func.func @transform_8(%arg0: i32, %arg1: i32) -> (i32, i32, i32, i32) {
    %c0_i32 = arith.constant 0 : i32
    %c0_i32_0 = arith.constant 0 : i32
    %c0_i32_1 = arith.constant 0 : i32
    return %arg0, %arg1, %c0_i32, %c0_i32_0 : i32, i32, i32, i32
  }
}

</mosaic_0001>

<bundles_post_ra>
// kernel: tpu_custom_call.1
= control target key start
LH: loop header
LB: loop body
LE: loop exit
PB: predicated region body
PF: predicated region fallthrough
CT: control target
= control target key end

     0   :  { %s2815_s0 = inlined_call_operand.hbm [shape: f32[2,8,32], index: 0, kind: input, shape index: {}]   ;;  %s2816_s1 = inlined_call_operand.hbm [shape: f32[2,8,32], index: 1, kind: input, shape index: {}]   ;;  %s2817_s2 = inlined_call_operand.hbm [shape: f32[2,8,32], index: 2, kind: input, shape index: {}]   ;;  %s2818_s3 = inlined_call_operand.hbm [shape: f32[1,32,32], index: 3, kind: input, shape index: {}]   ;;  %s2819_s4 = inlined_call_operand.vmem [shape: f32[1,1,32], index: 4, kind: input, shape index: {}]   ;;  %s2820_s5 = inlined_call_operand.hbm [shape: f32[1,32,32], index: 5, kind: input, shape index: {}]   ;;  %s2821_s6 = inlined_call_operand.vmem [shape: f32[1,32], index: 6, kind: input, shape index: {}]   ;;  %s2822_s7 = inlined_call_operand.hbm [shape: f32[2,8,32], index: 7, kind: output, shape index: {0}]   ;;  %s2823_s8 = inlined_call_operand.hbm [shape: f32[2,4,8,8], index: 8, kind: output, shape index: {1}]  }
   0x1   :  { %2844 = sst [smem:[#allocation25_spill]] %s2816_s1 }
   0x2   :  { %2845 = sst [smem:[#allocation26_spill]] %s2818_s3 }
   0x3   :  { %2846 = sst [smem:[#allocation27_spill]] %s2820_s5 }
   0x4   :  { %14 = vsyncpa [#allocation3], 0 }
   0x5   :  { %16 = vsyncpa [#allocation3 + $0x1], 0 }
   0x6   :  { %17 = vsyncpa [#allocation6], 0 }
   0x7   :  { %19 = vsyncpa [#allocation6 + $0x1], 0 }
   0x8   :  { %20 = vsyncpa [#allocation9], 0 }
   0x9   :  { %21 = vsyncpa [#allocation4], 0 }
   0xa   :  { %23 = vsyncpa [#allocation4 + $0x1], 0 }
   0xb   :  { %24 = vsyncpa [#allocation13], 0 }
   0xc   :  { %26 = vsyncpa [#allocation13 + $0x1], 0  ;;  %s2354_s27 = smov 0   ;;  %s2356_s28 = smov 0  }
   0xd   :  { %s2358_s29 = smov 0   ;;  %s2360_s30 = smov 0  }
   0xe   :  { %s2362_s9 = smov 0   ;;  %s2364_s10 = smov 0  }
   0xf LB: > { %2847 = sst [smem:[#allocation19_spill]] %s2268_s27  ;;  %s2385_s11 = sadd.s32 4294967295, %s2288_s10   ;;  %s2288_s10 = sphi %s2364_s10, %s32_s10   ;;  %s2284_s9 = sphi %s2362_s9, %s2885_s9   ;;  %s2280_s30 = sphi %s2360_s30, %s2884_s30   ;;  %s2276_s29 = sphi %s2358_s29, %s2888_s29   ;;  %s2272_s28 = sphi %s2356_s28, %s2887_s28   ;;  %s2268_s27 = sphi %s2354_s27, %s2886_s27  }
  0x10   : > { %2848 = sst [smem:[#allocation20_spill]] %s2284_s9  ;;  %s1704_s12 = sadd.s32 4294967294, %s2288_s10  }
  0x11   : > { %2849 = sst [smem:[#allocation21_spill]] %s2288_s10  ;;  %p64_p0 = scmp.ne.s32.totalorder %s2272_s28, %s2268_s27 }
  0x12   : > { %p2824_p1 = scmp.eq.s32.totalorder %s2385_s11, 0  ;;  %p245_p3 = scmp.eq.s32.totalorder %s1704_s12, 1 }
  0x13   : > { %p1705_p5 = scmp.ge.s32.totalorder %s2288_s10, 1  ;;  %p280_p7 = scmp.lt.s32.totalorder %s2288_s10, 3 }
  0x14   : > { %p2394_p4 = por %p2824_p1, %p64_p0  ;;  %p2399_p6 = por %p245_p3, %p64_p0 }
  0x15   : > { %p2404_p8 = pnand %p1705_p5, %p280_p7  ;;  %s2290_s16 = smov [#allocation8]  }
  0x16   : > { %s2850_s13 = scalar_select %p2394_p4, 1, 0 }
  0x17   : > { %s2851_s14 = scalar_select %p2399_p6, 1, 0 }
  0x18   : > { %s2853_s15 = scalar_select %p2404_p8, 1, 0 }
  0x19   : > { %2852 = sst [smem:[#allocation22_spill]] %s2851_s14  ;;  %s295_s17 = sshll.u32 %s2290_s16, 4  ;;  %s296_s17 = int_to_ptr.vmem [resolvable:$true] %s295_s17 }
  0x1a   : > { %p1912_p9 = pneg %p2404_p8  ;;  %s44_s19 = sadd.s32 1, %s2284_s9 }
  0x1b   : > { %s2855_s3 = sld [smem:[#allocation26_spill]] }
  0x1c   : > { %p2413_p11 = pnand %p1912_p9, %p2824_p1 }
  0x1e   : > { %s2854_s18 = scalar_select %p2413_p11, 1, 0 }
  0x1f   : > { %p2836_p13 = pneg %p2413_p11 }
  0x21   : > { %s2020_s22 = scalar_lea.hbm %s2855_s3, 512 }
  0x22   : > { %p2021_p12 = scmp.ne.s32.totalorder %s2855_s3, %s2020_s22  ;;  %p2027_p5 = scmp.lt.u32.totalorder %s2020_s22, %s2855_s3 }
  0x24   : > { %p2023_p0 = pnand %p2836_p13, %p2021_p12 }
  0x26   : > { %p2024_p3 = pneg %p2023_p0 }
  0x28   : > { %p2029_p7 = pnand %p2027_p5, %p2024_p3 }
  0x2a   : > { %2032 = shalt.err (!%p2029_p7)
}
  0x2b   : > { %s2033_s12 = scalar_lea.vmem %s296_s17, 512  ;;  %p2041_p2 = scmp.lt.s32.totalorder %s296_s17, %s296_s17 }
  0x2c   : > { %p2034_p9 = scmp.ne.s32.totalorder %s296_s17, %s2033_s12  ;;  %p2042_p6 = scmp.lt.s32.totalorder %s2033_s12, %s2033_s12 }
  0x2e   : > { %p2036_p10 = pnand %p2034_p9, %p2836_p13  ;;  %p2043_p4 = por %p2042_p6, %p2041_p2 }
  0x30   : > { %p2037_p1 = pneg %p2036_p10 }
  0x32   : > { %p2044_p8 = pnand %p2043_p4, %p2037_p1 }
  0x34   : > { %2047 = shalt.err (!%p2044_p8)
}
  0x35   : > { %s2827_s16 = smov 128   ;;  %s2828_s20 = smov 8  }
  0x36   : > { %1915 = dma.hbm_to_vmem [thread:$0]  (!%p2413_p11), %s2855_s3, 512, %s296_s17, [#allocation9], %s2827_s16, %s2827_s16, %s2828_s20  }
  0x37   : > { %p46_p1 = scmp.ge.s32.totalorder %s44_s19, 2  ;;  %s51_s23 = sadd.s32 1, %s2276_s29 }
  0x38   : > { %p58_p2 = scmp.ne.s32.totalorder %s2276_s29, %s2272_s28  ;;  %p59_p4 = scmp.eq.s32.totalorder %s2288_s10, 0 }
  0x39   : > { %s2890_s19 = smov (%p46_p1, %s44_s19), 0  ;;  %p2857_p8 = scmp.eq.s32.totalorder %s2385_s11, 1 }
  0x3a   : > { %2856 = sst [smem:[#allocation23_spill]] %s2890_s19  ;;  %p60_p6 = por %p59_p4, %p58_p2 }
  0x3b   : > { %p2451_p10 = por %p2857_p8, %p58_p2  ;;  %s48_s25 = ssub.s32 %s2284_s9, %s2890_s19 }
  0x3c   : > { %p1938_p12 = scmp.lt.s32.totalorder %s2288_s10, 2  ;;  %p49_p0 = scmp.eq.s32.totalorder %s48_s25, 0 }
  0x3d   : > { %s2858_s24 = scalar_select %p2451_p10, 1, 0 }
  0x3e   : > { %s2829_s26 = sand.u32 1, %s2276_s29   ;;  %s2464_s12 = sshll.u32 %s2284_s9, 7 }
  0x3f   : > { %s2461_s17 = sshll.u32 %s2829_s26, 3  ;;  %p2469_p3 = pnand %p1938_p12, %p60_p6 }
  0x40   : > { %s2467_s21 = scalar_select %p49_p0, %s2276_s29, %s51_s23  }
  0x41   : > { %s2860_s22 = scalar_select %p2469_p3, 1, 0 }
  0x42   : > { %2859 = sst [smem:[#allocation24_spill]] %s2467_s21  ;;  %s352_s16 = sand.u32 1, %s2288_s10  }
  0x43   : > { %s2861_s1 = sld [smem:[#allocation25_spill]]  ;;  %s356_s26 = scalar_lea.vmem [#allocation5], %s2461_s17 }
  0x44   : > { %s363_s19 = sshll.u32 %s356_s26, 4  ;;  %s2293_s23 = smov [#allocation10]   ;;  %s2481_s19 = int_to_ptr.vmem [resolvable:$true] %s363_s19 }
  0x45   : > { %s2483_s9 = sshll.u32 %s2293_s23, 4  ;;  %s2485_s21 = scalar_lea.sflag [#allocation6], %s352_s16  ;;  %s318_s9 = int_to_ptr.vmem [resolvable:$true] %s2483_s9 }
  0x46   : > { %p2491_p7 = pneg %p2469_p3 }
  0x48   : > { %s2862_s3 = scalar_select %p2491_p7, 1, 0 }
  0x49   : > { %s2478_s25 = scalar_lea.hbm %s2861_s1, %s2464_s12  ;;  %s2053_s10 = scalar_lea.hbm %s2861_s1, 256 }
  0x4a   : > { %s2048_s14 = scalar_lea.hbm %s2478_s25, 128  ;;  %p2054_p2 = scmp.lt.u32.totalorder %s2478_s25, %s2861_s1 }
  0x4b   : > { %p2049_p5 = scmp.ne.s32.totalorder %s2478_s25, %s2048_s14  ;;  %p2055_p4 = scmp.lt.u32.totalorder %s2053_s10, %s2048_s14 }
  0x4c   : > { %p2057_p8 = scmp.lt.u32.totalorder %s2048_s14, %s2478_s25 }
  0x4d   : > { %p2051_p9 = pnand %p2491_p7, %p2049_p5  ;;  %p2056_p6 = por %p2055_p4, %p2054_p2 }
  0x4f   : > { %p2052_p1 = pneg %p2051_p9  ;;  %p2058_p12 = por %p2057_p8, %p2056_p6 }
  0x51   : > { %p2059_p0 = pnand %p2058_p12, %p2052_p1 }
  0x53   : > { %2062 = shalt.err (!%p2059_p0)
}
  0x54   : > { %s2063_s16 = scalar_lea.vmem %s2481_s19, 128  ;;  %s2294_s20 = smov [#allocation5]  }
  0x55   : > { %p2064_p5 = scmp.ne.s32.totalorder %s2481_s19, %s2063_s16  ;;  %s2068_s26 = sshll.u32 %s2294_s20, 4  ;;  %s2069_s26 = int_to_ptr.vmem [resolvable:$false] %s2068_s26 }
  0x56   : > { %s2070_s27 = scalar_lea.vmem %s2069_s26, 256  ;;  %p2071_p10 = scmp.lt.s32.totalorder %s2481_s19, %s2069_s26 }
  0x57   : > { %p2066_p9 = pnand %p2064_p5, %p2491_p7  ;;  %p2072_p11 = scmp.lt.s32.totalorder %s2070_s27, %s2063_s16 }
  0x59   : > { %p2067_p13 = pneg %p2066_p9  ;;  %p2073_p2 = por %p2072_p11, %p2071_p10 }
  0x5b   : > { %p2074_p4 = pnand %p2073_p2, %p2067_p13 }
  0x5d   : > { %2077 = shalt.err (!%p2074_p4)
}
  0x5e   : > { %1925 = dma.hbm_to_vmem [thread:$0]  (!%p2469_p3), %s2478_s25, 128, %s2481_s19, %s2485_s21  }
  0x5f   : > { %s2863_s5 = sld [smem:[#allocation27_spill]]  ;;  %p2864_p11 = scmp.ne.s32.totalorder %s2854_s18, 0 }
  0x61   : > { %p2865_p13 = pneg %p2864_p11 }
  0x65   : > { %s2078_s23 = scalar_lea.hbm %s2863_s5, 512 }
  0x66   : > { %p2079_p1 = scmp.ne.s32.totalorder %s2863_s5, %s2078_s23  ;;  %p2085_p8 = scmp.lt.u32.totalorder %s2078_s23, %s2863_s5 }
  0x68   : > { %p2081_p10 = pnand %p2079_p1, %p2865_p13 }
  0x6a   : > { %p2082_p6 = pneg %p2081_p10 }
  0x6c   : > { %p2087_p12 = pnand %p2085_p8, %p2082_p6 }
  0x6e   : > { %2090 = shalt.err (!%p2087_p12)
}
  0x6f   : > { %s2091_s19 = scalar_lea.vmem %s318_s9, 512  ;;  %p2866_p5 = pmov %p2865_p13 }
  0x70   : > { %p2092_p0 = scmp.ne.s32.totalorder %s318_s9, %s2091_s19  ;;  %p2099_p4 = scmp.lt.s32.totalorder %s318_s9, %s318_s9 }
  0x71   : > { %p2100_p3 = scmp.lt.s32.totalorder %s2091_s19, %s2091_s19 }
  0x72   : > { %p2094_p9 = pnand %p2092_p0, %p2866_p5 }
  0x73   : > { %p2101_p7 = por %p2100_p3, %p2099_p4 }
  0x74   : > { %p2095_p2 = pneg %p2094_p9 }
  0x76   : > { %p2102_p1 = pnand %p2101_p7, %p2095_p2 }
  0x78   : > { %2105 = shalt.err (!%p2102_p1)
}
  0x79   : > { %s2867_s1 = smov 8   ;;  %s2868_s25 = smov 128  }
  0x7a   : > { %1918 = dma.hbm_to_vmem [thread:$0]  (!%p2864_p11), %s2863_s5, 512, %s318_s9, [#allocation9], %s2868_s25, %s2868_s25, %s2867_s1  }
  0x7b   : > { %s2543_s20 = scalar_lea.hbm %s2815_s0, %s2464_s12  ;;  %s338_s18 = scalar_lea.vmem [#allocation2], %s2461_s17 }
  0x7c   : > { %s345_s16 = sshll.u32 %s338_s18, 4  ;;  %s2552_s27 = scalar_lea.hbm %s2817_s2, %s2464_s12  ;;  %s2546_s16 = int_to_ptr.vmem [resolvable:$true] %s345_s16 }
  0x7d   : > { %s2869_s10 = sand.u32 1, %s2276_s29   ;;  %s2106_s1 = scalar_lea.hbm %s2543_s20, 128 }
  0x7e   : > { %s335_s9 = scalar_lea.sflag [#allocation3], %s2869_s10  ;;  %p2107_p3 = scmp.ne.s32.totalorder %s2543_s20, %s2106_s1 }
  0x7f   : > { %p2870_p7 = scmp.ne.s32.totalorder %s2862_s3, 0  ;;  %s2111_s23 = scalar_lea.hbm %s2815_s0, 256 }
  0x80   : > { %p2112_p10 = scmp.lt.u32.totalorder %s2543_s20, %s2815_s0  ;;  %p2113_p6 = scmp.lt.u32.totalorder %s2111_s23, %s2106_s1 }
  0x81   : > { %p2109_p11 = pnand %p2107_p3, %p2870_p7  ;;  %p2115_p12 = scmp.lt.u32.totalorder %s2106_s1, %s2543_s20 }
  0x82   : > { %p2114_p8 = por %p2113_p6, %p2112_p10 }
  0x83   : > { %p2110_p13 = pneg %p2109_p11 }
  0x84   : > { %p2116_p0 = por %p2115_p12, %p2114_p8 }
  0x86   : > { %p2117_p5 = pnand %p2116_p0, %p2110_p13 }
  0x88   : > { %2120 = shalt.err (!%p2117_p5)
}
  0x89   : > { %s2121_s12 = scalar_lea.vmem %s2546_s16, 128  ;;  %s2295_s26 = smov [#allocation2]  }
  0x8a   : > { %p2122_p9 = scmp.ne.s32.totalorder %s2546_s16, %s2121_s12  ;;  %s2126_s19 = sshll.u32 %s2295_s26, 4  ;;  %s2127_s19 = int_to_ptr.vmem [resolvable:$false] %s2126_s19 }
  0x8b   : > { %s2128_s5 = scalar_lea.vmem %s2127_s19, 256  ;;  %p2129_p1 = scmp.lt.s32.totalorder %s2546_s16, %s2127_s19 }
  0x8c   : > { %p2124_p2 = pnand %p2122_p9, %p2870_p7  ;;  %p2130_p3 = scmp.lt.s32.totalorder %s2128_s5, %s2121_s12 }
  0x8e   : > { %p2125_p4 = pneg %p2124_p2  ;;  %p2131_p11 = por %p2130_p3, %p2129_p1 }
  0x90   : > { %p2132_p10 = pnand %p2131_p11, %p2125_p4 }
  0x92   : > { %2135 = shalt.err (!%p2132_p10)
}
  0x93   : > { %p2871_p13 = scmp.ne.s32.totalorder %s2860_s22, 0  ;;  %s374_s10 = scalar_lea.vmem [#allocation7], %s2461_s17 }
  0x94   : > { %s381_s1 = sshll.u32 %s374_s10, 4  ;;  %s2136_s25 = scalar_lea.hbm %s2552_s27, 128  ;;  %s382_s1 = int_to_ptr.vmem [resolvable:$true] %s381_s1 }
  0x95   : > { %1922 = dma.hbm_to_vmem [thread:$0]  (!%p2871_p13), %s2543_s20, 128, %s2546_s16, %s335_s9  }
  0x96   : > { %p2137_p6 = scmp.ne.s32.totalorder %s2552_s27, %s2136_s25  ;;  %s2141_s18 = scalar_lea.hbm %s2817_s2, 256 }
  0x97   : > { %p2142_p0 = scmp.lt.u32.totalorder %s2552_s27, %s2817_s2  ;;  %p2143_p5 = scmp.lt.u32.totalorder %s2141_s18, %s2136_s25 }
  0x98   : > { %p2139_p8 = pnand %p2137_p6, %p2870_p7  ;;  %p2145_p2 = scmp.lt.u32.totalorder %s2136_s25, %s2552_s27 }
  0x99   : > { %p2144_p9 = por %p2143_p5, %p2142_p0 }
  0x9a   : > { %p2140_p12 = pneg %p2139_p8 }
  0x9b   : > { %p2146_p4 = por %p2145_p2, %p2144_p9 }
  0x9d   : > { %p2147_p1 = pnand %p2146_p4, %p2140_p12 }
  0x9f   : > { %2150 = shalt.err (!%p2147_p1)
}
  0xa0   : > { %s2151_s17 = scalar_lea.vmem %s382_s1, 128  ;;  %s2296_s20 = smov [#allocation7]  }
  0xa1   : > { %p2152_p3 = scmp.ne.s32.totalorder %s382_s1, %s2151_s17  ;;  %s2156_s16 = sshll.u32 %s2296_s20, 4  ;;  %s2157_s16 = int_to_ptr.vmem [resolvable:$false] %s2156_s16 }
  0xa2   : > { %s2158_s9 = scalar_lea.vmem %s2157_s16, 256  ;;  %p2159_p6 = scmp.lt.s32.totalorder %s382_s1, %s2157_s16 }
  0xa3   : > { %p2154_p11 = pnand %p2152_p3, %p2870_p7  ;;  %p2160_p8 = scmp.lt.s32.totalorder %s2158_s9, %s2151_s17 }
  0xa5   : > { %p2155_p10 = pneg %p2154_p11  ;;  %p2161_p13 = por %p2160_p8, %p2159_p6 }
  0xa7   : > { %p2162_p0 = pnand %p2161_p13, %p2155_p10 }
  0xa9   : > { %2165 = shalt.err (!%p2162_p0)
}
  0xaa   : > { %p2872_p5 = scmp.ne.s32.totalorder %s2860_s22, 0  ;;  %p2873_p12 = scmp.ne.s32.totalorder %s2853_s15, 0 }
  0xab   : > { %s2599_s3 = sand.u32 (!%p2873_p12), 1, %s2272_s28   ;;  %p2874_p7 = scmp.ne.s32.totalorder (!%p2873_p12), %s2850_s13, 0 }
  0xac   : > { %1928 = dma.hbm_to_vmem [thread:$0]  (!%p2872_p5), %s2552_s27, 128, %s382_s1, %s2485_s21  }
  0xad   : > { %390 = sbr.rel (%p2873_p12) target bundleno = 2091 (0x82b), region = 48  ;;  %s2602_s19 = sshll.u32 (!%p2873_p12), %s2599_s3, 3 }
  0xae   : > { %s393_s5 = scalar_lea.sflag (!%p2873_p12), [#allocation3], %s2599_s3  ;;  %s396_s10 = scalar_lea.vmem (!%p2873_p12), [#allocation2], %s2602_s19 }
  0xb4   : > { %2247 = dma.done.wait (%p2874_p7), %s393_s5, 128  }
  0xb5   : > { %2249 = vsyncadd (%p2874_p7), %s393_s5, 4294967168  ;;  %s401_s15 = sand.u32 1, %s2385_s11   ;;  %s405_s22 = scalar_lea.vmem [#allocation5], %s2602_s19 }
  0xb6   : > { %s402_s21 = scalar_lea.sflag [#allocation6], %s401_s15 }
  0xb7   : > { %2251 = dma.done.wait (%p2874_p7), %s402_s21, 256  }
  0xb8   : > { %2253 = vsyncadd (%p2874_p7), %s402_s21, 4294967040  ;;  %s414_s27 = scalar_lea.vmem [#allocation7], %s2602_s19  ;;  %p2875_p13 = scmp.eq.s32.totalorder %s2385_s11, 0 }
  0xba   : > { %2255 = dma.done.wait (%p2875_p13), [#allocation9], 1024   ;;  %p2876_p9 = pmov %p2875_p13 }
  0xbb   : > { %v2297_v0 = vmov 0.0|0.0   ;;  %vm2298_vm0 = vmmov 0   ;;  %v2299_v1 = vmov 0.0   ;;  %v477_v2 = vld [vmem:[#allocation8] sm:$0xff]  ;;  %v478_v3 = vld [vmem:[#allocation8 + $0x8] sm:$0xff]  ;;  %v479_v4 = vld [vmem:[#allocation8 + $0x10] sm:$0xff] }
  0xbc   : > { %2257 = vsyncadd (%p2876_p9), [#allocation9], 4294966272  ;;  %1876 = vmatprep.subr.bf16.mxu1 %v2297_v0  ;;  %1870 = vmatprep.subr.bf16.mxu0 %v2297_v0  ;;  %v1871_v5 = vpack.c.bf16 %v478_v3, %v477_v2  ;;  %v480_v6 = vld [vmem:[#allocation8 + $0x18] sm:$0xff]  ;;  %v487_v8 = vld [vmem:[%s405_s22] sm:$0xff]  ;;  %vm495_vm1 = vcmask 261120   ;;  %vm716_vm2 = vcmask 64512  }
  0xbd   : > { %1805 = vmatprep.mubr.msk.f32.mxu1 %vm2298_vm0, %v2299_v1  ;;  %1794 = vmatprep.mubr.msk.f32.mxu0 %vm2298_vm0, %v2299_v1  ;;  %v1874_v7 = vpack.c.bf16 %v480_v6, %v479_v4  ;;  %v486_v9 = vld [vmem:[%s396_s10] sm:$0xff]  ;;  %s2300_s1 = smov 120   ;;  %s2301_s25 = smov 112   ;;  %vm1390_vm3 = vcmask 130048   ;;  %vm1392_vm4 = vcmask 195584  }
  0xbe   : > { %1878 = vmatpush3.bf16.msra.mxu1 %v1871_v5  ;;  %1872 = vmatpush3.bf16.msra.mxu0 %v1871_v5  ;;  %v1724_v10 = vld [vmem:[%s2819_s4] ss:$0 sm:$0xff]  ;;  %s2302_s14 = smov 104   ;;  %s1723_s23 = sshll.u32 %s2599_s3, 5 }
  0xbf   : > { %1879 = vmatprep.subr.bf16.mxu1 %v2297_v0  ;;  %1873 = vmatprep.subr.bf16.mxu0 %v2297_v0  ;;  %v488_v18 = vld [vmem:[%s414_s27] sm:$0xff]  ;;  %s2677_s18 = scalar_lea.vmem [#allocation12], %s1723_s23  ;;  %s2303_s12 = smov 8  }
  0xc0   : > { %s2304_s26 = smov 16   ;;  %s2305_s17 = smov 24  }
  0xc1   : > { %s1749_s20 = sshll.u32 %s2280_s30, 9  ;;  %s1509_s16 = sshll.u32 %s2677_s18, 4  ;;  %s2730_s16 = int_to_ptr.vmem [resolvable:$true] %s1509_s16 }
  0xc2   : > { %1881 = vmatpush3.bf16.msra.mxu1 %v1874_v7  ;;  %1875 = vmatpush3.bf16.msra.mxu0 %v1874_v7  ;;  %s2728_s10 = scalar_lea.hbm %s2823_s8, %s1749_s20  ;;  %s1481_s15 = scalar_lea.sflag [#allocation13], %s2599_s3 }
  0xc3   : > { %1819 = vmatprep.subr.mxu1 %v2299_v1  ;;  %1882 = vmatprep.subr.bf16.mxu0 %v2297_v0  ;;  %s2166_s21 = scalar_lea.vmem %s2730_s16, 512  ;;  %p2877_p4 = scmp.ne.s32.totalorder %s2858_s24, 0 }
  0xc4   : > { %p2167_p2 = scmp.ne.s32.totalorder %s2730_s16, %s2166_s21  ;;  %s2306_s22 = smov [#allocation12]  }
  0xc5   : > { %1806 = vmatmul.mubr.msk.f32.vlgmr.msra.gmra.mrb[0].mxu1 %vm495_vm1, %v487_v8  ;;  %1795 = vmatmul.mubr.msk.f32.vlgmr.msra.gmra.mrb[0].mxu0 %vm495_vm1, %v486_v9  ;;  %s2170_s27 = sshll.u32 %s2306_s22, 4  ;;  %s2171_s27 = int_to_ptr.vmem [resolvable:$false] %s2170_s27 }
  0xc6   : > { %1821 = vmatprep.mubr.msk.f32.mxu1 %vm2298_vm0, %v2299_v1  ;;  %1884 = vmatpush3.bf16.msra.mxu0 %v1871_v5  ;;  %p2168_p1 = pnand %p2167_p2, %p2877_p4  ;;  %s2172_s11 = scalar_lea.vmem %s2171_s27, 1024 }
  0xc7   : > { %1885 = vmatprep.subr.bf16.mxu0 %v2297_v0  ;;  %1816 = vmatprep.mubr.msk.f32.mxu0 %vm2298_vm0, %v2299_v1  ;;  %p2173_p11 = scmp.lt.s32.totalorder %s2730_s16, %s2171_s27  ;;  %p2174_p10 = scmp.lt.s32.totalorder %s2172_s11, %s2166_s21 }
  0xc8   : > { %p2169_p3 = pneg %p2168_p1 }
  0xc9   : > { %p2175_p6 = por %p2174_p10, %p2173_p11 }
  0xca   : > { %1887 = vmatpush3.bf16.msra.mxu0 %v1874_v7 }
  0xcb   : > { %1839 = vmatprep.subr.mxu0 %v2299_v1  ;;  %p2176_p8 = pnand %p2175_p6, %p2169_p3 }
  0xcd   : > { %1817 = vmatmul.mubr.msk.f32.vlgmr.msra.gmra.mrb[2].mxu0 %vm495_vm1, %v488_v18  ;;  %v484_v18 = vld [vmem:[#allocation10 + $0x10] sm:$0xff] }
  0xce   : > { %1841 = vmatprep.mubr.msk.f32.mxu0 %vm2298_vm0, %v2299_v1 }
 0x198   : > { %v639_v11 = vpop.f32.mrb[0].mxu1  ;;  %v565_v12 = vpop.f32.mrb[0].mxu0 }
 0x199   : > { %v640_v13 = vadd.f32 %v1724_v10, %v639_v11  ;;  %v566_v14 = vadd.f32 %v1724_v10, %v565_v12  ;;  %v1807_v15 = vpop.f32.mrb[1].mxu1  ;;  %v1796_v16 = vpop.f32.mrb[1].mxu0 }
 0x19a   : > { %v482_v15 = vld [vmem:[#allocation10] sm:$0xff]  ;;  %v483_v16 = vld [vmem:[#allocation10 + $0x8] sm:$0xff] }
 0x19b   : > { %v569_v17 = vmul.f32 0.35355338, %v566_v14  ;;  %879 = vrot.lane.b32.xlu1 %v640_v13, %s2300_s1  ;;  %1820 = vmatpush3.xpose.msk.msra.mxu1 %vm716_vm2, %v640_v13 }
 0x19c   : > { %1824 = vmatprep.subr.mxu1 %v2299_v1 }
 0x19e   : > { %1822 = vmatmul.mubr.msk.f32.vlgmr.msra.gmra.mrb[2].mxu1 %vm716_vm2, %v569_v17 }
 0x19f   : > { %877 = vrot.lane.b32.xlu1 %v569_v17, %s2300_s1  ;;  %1826 = vmatprep.mubr.msk.f32.mxu1 %vm2298_vm0, %v2299_v1 }
 0x1a0   : > { %v712_v27 = vpop.f32.mrb[2].mxu0 }
 0x1a1   : > { %v2661_v28 = vadd.f32 %v1724_v10, %v712_v27  ;;  %v1818_v29 = vpop.f32.mrb[3].mxu0 }
 0x1a3   : > { %1043 = vrot.lane.b32.xlu1 %v569_v17, %s2301_s25  ;;  %1825 = vmatpush3.msra.mxu1 %v2661_v28 }
 0x1a4   : > { %1829 = vmatprep.subr.mxu1 %v2299_v1 }
 0x1a7   : > { %1210 = vrot.lane.b32.xlu1 %v640_v13, %s2302_s14 }
 0x1ab   : > { %1208 = vrot.lane.b32.xlu1 %v569_v17, %s2302_s14  ;;  %v1889_v17 = vpack.c.bf16 %v483_v16, %v482_v15 }
 0x20d   : > { %v880_v30 = vpop.permute.xlu1 %879 }
 0x211   : > { %v878_v31 = vpop.permute.xlu1 %877 }
 0x215   : > { %v1044_v32 = vpop.permute.xlu1 %1043 }
 0x219   : > { %v1211_v35 = vpop.permute.xlu1 %1210 }
 0x21d   : > { %v1209_v37 = vpop.permute.xlu1 %1208 }
 0x271   : > { %v789_v19 = vpop.f32.mrb[2].mxu1 }
 0x272   : > { %v1823_v20 = vpop.f32.mrb[3].mxu1  ;;  %v793_v21 = vsel %vm716_vm2, %v789_v19, -inf }
 0x273   : > { %794 = vmax.xlane.f32.xlu0 %v793_v21 }
 0x300   : > { %v795_v22 = vpop.xlane.xlu0 %794 }
 0x301   : > { %v796_v23 = vsub.f32 %v789_v19, %v795_v22  ;;  %v485_v19 = vld [vmem:[#allocation10 + $0x18] sm:$0xff] }
 0x302   : > { %v1892_v20 = vpack.c.bf16 %v485_v19, %v484_v18 }
 0x303   : > { %v797_v24 = vmul.f32 1.442695, %v796_v23 }
 0x305   : > { %2004 = vpow2.f32 %v797_v24 }
 0x30f   : > { %v2005_v25 = vpop.eup %2004 }
 0x310   : > { %v799_v26 = vsel %vm716_vm2, %v2005_v25, 0.0 }
 0x311   : > { %800 = vadd.xlane.f32.xlu0 %v799_v26 }
 0x327   : > { %1045 = vrot.lane.b32.xlu0 %v640_v13, %s2301_s25 }
 0x39e   : > { %v801_v33 = vpop.xlane.xlu0 %800 }
 0x39f   : > { %2006 = vrcp.f32 %v801_v33 }
 0x3a2   : > { %v1046_v34 = vpop.permute.xlu0 %1045 }
 0x3a3   : > { %1840 = vmatpush3.xpose.msk.msra.mxu0 %vm716_vm2, %v1046_v34 }
 0x3a4   : > { %1849 = vmatprep.subr.mxu0 %v2299_v1 }
 0x3a6   : > { %1842 = vmatmul.mubr.msk.f32.vlgmr.msra.gmra.mrb[4].mxu0 %vm716_vm2, %v1044_v32 }
 0x3a7   : > { %1850 = vmatpush3.xpose.msk.msra.mxu0 %vm716_vm2, %v1211_v35  ;;  %1851 = vmatprep.mubr.msk.f32.mxu0 %vm2298_vm0, %v2299_v1 }
 0x3a8   : > { %1888 = vmatprep.subr.bf16.mxu0 %v2297_v0 }
 0x3a9   : > { %v2007_v36 = vpop.eup %2006 }
 0x3aa   : > { %v803_v38 = vmul.f32 %v2007_v36, %v2005_v25  ;;  %1852 = vmatmul.mubr.msk.f32.vlgmr.msra.gmra.mrb[6].mxu0 %vm716_vm2, %v1209_v37 }
 0x3ab   : > { %1867 = vmatprep.mubr.msk.f32.mxu0 %vm2298_vm0, %v2299_v1  ;;  %1890 = vmatpush3.bf16.msra.mxu0 %v1889_v17 }
 0x3ac   : > { %1373 = vst.msk [vmem:[%s2677_s18] sm:$0xff] %vm716_vm2, %v803_v38  ;;  %1827 = vmatmul.mubr.msk.f32.vlgmr.msra.gmra.mrb[4].mxu1 %vm716_vm2, %v803_v38  ;;  %1891 = vmatprep.subr.bf16.mxu0 %v2297_v0 }
 0x3ad   : > { %1830 = vmatpush3.xpose.msk.msra.mxu1 %vm716_vm2, %v880_v30  ;;  %1831 = vmatprep.mubr.msk.f32.mxu1 %vm2298_vm0, %v2299_v1 }
 0x3ae   : > { %1834 = vmatprep.subr.mxu1 %v2299_v1 }
 0x3af   : > { %1893 = vmatpush3.bf16.msra.mxu0 %v1892_v20 }
 0x3b0   : > { %1832 = vmatmul.mubr.msk.f32.vlgmr.msra.gmra.mrb[6].mxu1 %vm716_vm2, %v878_v31 }
 0x3b1   : > { %1836 = vmatprep.mubr.msk.f32.mxu1 %vm2298_vm0, %v2299_v1 }
 0x479   : > { %v1117_v39 = vpop.f32.mrb[4].mxu0 }
 0x47a   : > { %v1843_v40 = vpop.f32.mrb[5].mxu0  ;;  %v1121_v41 = vsel %vm716_vm2, %v1117_v39, -inf }
 0x47b   : > { %1122 = vmax.xlane.f32.xlu0 %v1121_v41 }
 0x47d   : > { %v1282_v42 = vpop.f32.mrb[6].mxu0 }
 0x47e   : > { %v1853_v43 = vpop.f32.mrb[7].mxu0  ;;  %v1286_v49 = vsel %vm716_vm2, %v1282_v42, -inf }
 0x47f   : > { %v2690_v44 = vpop.f32.mrb[4].mxu1 }
 0x480   : > { %v1828_v45 = vpop.f32.mrb[5].mxu1 }
 0x483   : > { %v951_v46 = vpop.f32.mrb[6].mxu1 }
 0x484   : > { %v1833_v47 = vpop.f32.mrb[7].mxu1  ;;  %v955_v48 = vsel %vm716_vm2, %v951_v46, -inf }
 0x485   : > { %956 = vmax.xlane.f32.xlu1 %v955_v48 }
 0x489   : > { %1287 = vmax.xlane.f32.xlu1 %v1286_v49 }
 0x508   : > { %v1123_v50 = vpop.xlane.xlu0 %1122 }
 0x509   : > { %v1124_v51 = vsub.f32 %v1117_v39, %v1123_v50 }
 0x50b   : > { %v1125_v52 = vmul.f32 1.442695, %v1124_v51 }
 0x50d   : > { %2008 = vpow2.f32 %v1125_v52 }
 0x512   : > { %v957_v53 = vpop.xlane.xlu1 %956 }
 0x513   : > { %v958_v61 = vsub.f32 %v951_v46, %v957_v53 }
 0x515   : > { %v959_v62 = vmul.f32 1.442695, %v958_v61 }
 0x516   : > { %v1288_v54 = vpop.xlane.xlu1 %1287 }
 0x517   : > { %v2009_v55 = vpop.eup %2008  ;;  %v1289_v56 = vsub.f32 %v1282_v42, %v1288_v54 }
 0x518   : > { %v1127_v57 = vsel %vm716_vm2, %v2009_v55, 0.0 }
 0x519   : > { %v1290_v58 = vmul.f32 1.442695, %v1289_v56  ;;  %1128 = vadd.xlane.f32.xlu0 %v1127_v57 }
 0x51b   : > { %2010 = vpow2.f32 %v1290_v58 }
 0x51c   : > { %2012 = vpow2.f32 %v959_v62 }
 0x525   : > { %v2011_v59 = vpop.eup %2010 }
 0x526   : > { %v1292_v60 = vsel %vm716_vm2, %v2011_v59, 0.0  ;;  %v2013_v63 = vpop.eup %2012 }
 0x527   : > { %1293 = vadd.xlane.f32.xlu1 %v1292_v60  ;;  %v961_v2 = vsel %vm716_vm2, %v2013_v63, 0.0 }
 0x52f   : > { %967 = vrot.lane.b32.xlu0 %v2661_v28, %s2300_s1 }
 0x538   : > { %1132 = vrot.lane.b32.xlu1 %v2661_v28, %s2301_s25 }
 0x55c   : > { %962 = vadd.xlane.f32.xlu1 %v961_v2 }
 0x56d   : > { %1297 = vrot.lane.b32.xlu1 %v2661_v28, %s2302_s14 }
 0x5a6   : > { %v1129_v3 = vpop.xlane.xlu0 %1128 }
 0x5a7   : > { %2014 = vrcp.f32 %v1129_v3 }
 0x5aa   : > { %v968_v4 = vpop.permute.xlu0 %967 }
 0x5ab   : > { %1835 = vmatpush3.msra.mxu1 %v968_v4 }
 0x5ac   : > { %1844 = vmatprep.subr.mxu1 %v2299_v1 }
 0x5b1   : > { %v2015_v5 = vpop.eup %2014 }
 0x5b2   : > { %v1131_v6 = vmul.f32 %v2015_v5, %v2009_v55 }
 0x5b4   : > { %1375 = vst.msk [vmem:[%s2677_s18 + $0x10] sm:$0xff] %vm716_vm2, %v1131_v6  ;;  %v1294_v7 = vpop.xlane.xlu1 %1293 }
 0x5b5   : > { %2016 = vrcp.f32 %v1294_v7 }
 0x5b8   : > { %v1133_v10 = vpop.permute.xlu1 %1132 }
 0x5bf   : > { %v2017_v8 = vpop.eup %2016 }
 0x5c0   : > { %v1296_v9 = vmul.f32 %v2017_v8, %v2011_v59 }
 0x5c2   : > { %1376 = vst.msk [vmem:[%s2677_s18 + $0x18] sm:$0xff] %vm716_vm2, %v1296_v9 }
 0x5e9   : > { %v963_v11 = vpop.xlane.xlu1 %962 }
 0x5ea   : > { %2018 = vrcp.f32 %v963_v11 }
 0x5ed   : > { %v1298_v14 = vpop.permute.xlu1 %1297 }
 0x5f4   : > { %v2019_v12 = vpop.eup %2018 }
 0x5f5   : > { %v965_v13 = vmul.f32 %v2019_v12, %v2013_v63 }
 0x5f7   : > { %1374 = vst.msk [vmem:[%s2677_s18 + $0x8] sm:$0xff] %vm716_vm2, %v965_v13  ;;  %1837 = vmatmul.mubr.msk.f32.vlgmr.msra.gmra.mrb[8].mxu1 %vm716_vm2, %v965_v13 }
 0x5f8   : > { %1845 = vmatpush3.msra.mxu1 %v1133_v10  ;;  %1846 = vmatprep.mubr.msk.f32.mxu1 %vm2298_vm0, %v2299_v1 }
 0x5f9   : > { %1854 = vmatprep.subr.mxu1 %v2299_v1 }
 0x5fb   : > { %1847 = vmatmul.mubr.msk.f32.vlgmr.msra.gmra.mrb[10].mxu1 %vm716_vm2, %v1131_v6 }
 0x5fc   : > { %1855 = vmatpush3.msra.mxu1 %v1298_v14  ;;  %1856 = vmatprep.mubr.msk.f32.mxu1 %vm2298_vm0, %v2299_v1 }
 0x5ff   : > { %1857 = vmatmul.mubr.msk.f32.vlgmr.msra.gmra.mrb[12].mxu1 %vm716_vm2, %v1296_v9 }
 0x6ca   : > { %v1039_v21 = vpop.f32.mrb[8].mxu1 }
 0x6cb   : > { %1378 = vrot.lane.b32.xlu0 %v1039_v21, %s2303_s12  ;;  %v1838_v22 = vpop.f32.mrb[9].mxu1 }
 0x6ce   : > { %v1204_v23 = vpop.f32.mrb[10].mxu1 }
 0x6cf   : > { %1382 = vrot.lane.b32.xlu1 %v1204_v23, %s2304_s26  ;;  %v1848_v1 = vpop.f32.mrb[11].mxu1 }
 0x6d2   : > { %v1369_v24 = vpop.f32.mrb[12].mxu1 }
 0x6d3   : > { %1386 = vrot.lane.b32.xlu0 %v1369_v24, %s2305_s17  ;;  %v1858_v0 = vpop.f32.mrb[13].mxu1 }
 0x73d   : > { %v1379_v25 = vpop.permute.xlu0 %1378 }
 0x73e   : > { %v1389_v27 = vsel %vm716_vm2, %v2690_v44, %v1379_v25 }
 0x741   : > { %v1383_v26 = vpop.permute.xlu1 %1382 }
 0x742   : > { %v1391_v28 = vsel %vm1390_vm3, %v1389_v27, %v1383_v26 }
 0x745   : > { %v1387_v29 = vpop.permute.xlu0 %1386 }
 0x746   : > { %v1393_v30 = vsel %vm1392_vm4, %v1391_v28, %v1387_v29 }
 0x747   : > { %1868 = vmatmul.mubr.msk.f32.vlgmr.msra.gmra.mrb[8].mxu0 %vm495_vm1, %v1393_v30 }
 0x748   : > { %2179 = shalt.err (!%p2176_p8)
}
 0x749   : > { %s2180_s13 = scalar_lea.hbm %s2728_s10, 512  ;;  %s2184_s14 = scalar_lea.hbm %s2823_s8, 1024 }
 0x74a   : > { %p2181_p0 = scmp.ne.s32.totalorder %s2728_s10, %s2180_s13  ;;  %p2185_p7 = scmp.lt.u32.totalorder %s2728_s10, %s2823_s8 }
 0x74b   : > { %p2186_p13 = scmp.lt.u32.totalorder %s2184_s14, %s2180_s13  ;;  %p2188_p2 = scmp.lt.u32.totalorder %s2180_s13, %s2728_s10 }
 0x74c   : > { %p2182_p5 = pnand %p2181_p0, %p2877_p4 }
 0x74d   : > { %p2187_p9 = por %p2186_p13, %p2185_p7 }
 0x74e   : > { %p2183_p12 = pneg %p2182_p5 }
 0x74f   : > { %p2189_p1 = por %p2188_p2, %p2187_p9 }
 0x751   : > { %p2190_p3 = pnand %p2189_p1, %p2183_p12 }
 0x753   : > { %2193 = shalt.err (!%p2190_p3)
}
 0x754   : > { %s2307_s26 = smov 128   ;;  %v1740_v31 = vld [vmem:[%s2821_s6] ss:$0 sm:$0xff]  ;;  %s1744_s9 = sshll.u32 %s2280_s30, 7 }
 0x755   : > { %1909 = dma.vmem_to_hbm [thread:$0]  (%p2877_p4), %s2730_s16, 512, %s2728_s10, %s1481_s15, %s2307_s26, %s2307_s26, %s2303_s12  }
 0x756   : > { %s465_s5 = scalar_lea.vmem [#allocation11], %s2602_s19  ;;  %s2765_s11 = scalar_lea.hbm %s2822_s7, %s1744_s9 }
 0x757   : > { %s1494_s21 = sshll.u32 %s465_s5, 4  ;;  %s1476_s12 = scalar_lea.sflag [#allocation4], %s2599_s3  ;;  %s2767_s21 = int_to_ptr.vmem [resolvable:$true] %s1494_s21 }
 0x758   : > { %s2194_s16 = scalar_lea.vmem %s2767_s21, 128  ;;  %s2308_s30 = smov [#allocation11]  }
 0x759   : > { %p2195_p11 = scmp.ne.s32.totalorder %s2767_s21, %s2194_s16  ;;  %s2198_s19 = sshll.u32 %s2308_s30, 4  ;;  %s2199_s19 = int_to_ptr.vmem [resolvable:$false] %s2198_s19 }
 0x75a   : > { %s2200_s10 = scalar_lea.vmem %s2199_s19, 256  ;;  %p2201_p8 = scmp.lt.s32.totalorder %s2767_s21, %s2199_s19 }
 0x75b   : > { %p2196_p10 = pnand %p2195_p11, %p2877_p4  ;;  %p2202_p0 = scmp.lt.s32.totalorder %s2200_s10, %s2194_s16 }
 0x75d   : > { %p2197_p6 = pneg %p2196_p10  ;;  %p2203_p5 = por %p2202_p0, %p2201_p8 }
 0x75f   : > { %p2204_p12 = pnand %p2203_p5, %p2197_p6 }
 0x81a   : > { %v1470_v32 = vpop.f32.mrb[8].mxu0 }
 0x81b   : > { %v1471_v33 = vadd.f32 %v1740_v31, %v1470_v32  ;;  %v1869_v34 = vpop.f32.mrb[9].mxu0 }
 0x81d   : > { %1474 = vst.msk [vmem:[%s465_s5] sm:$0xff] %vm495_vm1, %v1471_v33 }
 0x81e   : > { %2207 = shalt.err (!%p2204_p12)
}
 0x81f   : > { %s2208_s3 = scalar_lea.hbm %s2765_s11, 128  ;;  %s2212_s1 = scalar_lea.hbm %s2822_s7, 256 }
 0x820   : > { %p2209_p7 = scmp.ne.s32.totalorder %s2765_s11, %s2208_s3  ;;  %p2213_p2 = scmp.lt.u32.totalorder %s2765_s11, %s2822_s7 }
 0x821   : > { %p2214_p1 = scmp.lt.u32.totalorder %s2212_s1, %s2208_s3  ;;  %p2216_p11 = scmp.lt.u32.totalorder %s2208_s3, %s2765_s11 }
 0x822   : > { %p2210_p13 = pnand %p2209_p7, %p2877_p4 }
 0x823   : > { %p2215_p3 = por %p2214_p1, %p2213_p2 }
 0x824   : > { %p2211_p9 = pneg %p2210_p13 }
 0x825   : > { %p2217_p10 = por %p2216_p11, %p2215_p3 }
 0x827   : > { %p2218_p6 = pnand %p2217_p10, %p2211_p9 }
 0x829   : > { %2221 = shalt.err (!%p2218_p6)
}
 0x82a   : > { %1908 = dma.vmem_to_hbm [thread:$0]  (%p2877_p4), %s2767_s21, 128, %s2765_s11, %s1476_s12  }
 0x82b PF: > { %s2878_s23 = sld [smem:[#allocation19_spill]]  ;;  %s2879_s18 = sld [smem:[#allocation22_spill]] }
 0x82c   : > { %s2880_s26 = sld [smem:[#allocation21_spill]] }
 0x831   : > { %s1524_s17 = sand.u32 1, %s2878_s23   ;;  %p2881_p8 = scmp.ne.s32.totalorder %s2879_s18, 0 }
 0x832   : > { %p2882_p0 = scmp.ge.s32.totalorder %s2880_s26, 2  ;;  %s1525_s20 = scalar_lea.sflag [#allocation4], %s1524_s17 }
 0x834   : > { %p1930_p5 = pnand %p2882_p0, %p2881_p8 }
 0x836   : > { %2259 = dma.done.wait (!%p1930_p5), %s1525_s20, 128  }
 0x837   : > { %2261 = vsyncadd (!%p1930_p5), %s1525_s20, 4294967168  ;;  %s1534_s9 = scalar_lea.sflag [#allocation13], %s1524_s17 }
 0x838   : > { %2263 = dma.done.wait (!%p1930_p5), %s1534_s9, 512  }
 0x839   : > { %2265 = vsyncadd (!%p1930_p5), %s1534_s9, 4294966784  ;;  %s32_s10 = sadd.s32 1, %s2880_s26   ;;  %s2883_s24 = sld [smem:[#allocation24_spill]] }
 0x83a   : > { %p29_p12 = scmp.ge.s32.totalorder %s32_s10, 4   ;;  %s2884_s30 = sld [smem:[#allocation20_spill]] }
 0x83b   : > { %s2885_s9 = sld [smem:[#allocation23_spill]]  ;;  %s2886_s27 = smov %s2272_s28 }
 0x83c   : > { %s2887_s28 = smov %s2276_s29  ;;  %31 = sbr.rel (!%p29_p12) target bundleno = 15 (0xf), region = 147 }
 0x83f   : > { %s2888_s29 = smov %s2883_s24 }
 0x843   :  { %1539 = vsyncpa [#allocation3], 1 }
 0x844   :  { %1541 = vsyncpa [#allocation3 + $0x1], 1 }
 0x845   :  { %1542 = vsyncpa [#allocation6], 1 }
 0x846   :  { %1544 = vsyncpa [#allocation6 + $0x1], 1 }
 0x847   :  { %1545 = vsyncpa [#allocation9], 1 }
 0x848   :  { %1546 = vsyncpa [#allocation4], 1 }
 0x849   :  { %1548 = vsyncpa [#allocation4 + $0x1], 1 }
 0x84a   :  { %1549 = vsyncpa [#allocation13], 1 }
 0x84b   :  { %1551 = vsyncpa [#allocation13 + $0x1], 1 }

</bundles_post_ra>
